<compile_context>
chip_gen: v5e
topology: v5e:2x2
jax: 0.10.0
libtpu: 0.0.40
codegen_flags: <defaults>
</compile_context>

<pallas_src>
import math

import jax
import jax.numpy as jnp
from jax.experimental import pallas as pl
from jax.experimental.pallas import tpu as pltpu


def _round_up(x: int, m: int) -> int:
    return (x + m - 1) // m * m


def _cond_mul_kernel_fused(tile_class_ref, x_ref, w_ref, b_ref, o_ref):
    # Single-K-tile path: no accumulator scratch needed.
    # x_ref: (TM, TK)  w_ref: (1, TK, TN)  b_ref: (1, 1, TN)  o_ref: (TM, TN)
    del tile_class_ref
    acc = jnp.dot(x_ref[...], w_ref[0], preferred_element_type=jnp.float32)
    o_ref[...] = (acc + b_ref[0]).astype(o_ref.dtype)


def _cond_mul_kernel_acc(tile_class_ref, x_ref, w_ref, b_ref, o_ref, acc_ref):
    # K-split path: f32 accumulator scratch, init on first K tile, finalize on last.
    del tile_class_ref
    ki = pl.program_id(2)

    @pl.when(ki == 0)
    def _():
        acc_ref[...] = jnp.zeros_like(acc_ref)

    acc_ref[...] += jnp.dot(x_ref[...], w_ref[0],
                            preferred_element_type=jnp.float32)

    @pl.when(ki == pl.num_programs(2) - 1)
    def _():
        o_ref[...] = (acc_ref[...] + b_ref[0]).astype(o_ref.dtype)


def cond_mul(x, inds, w, b, *, compute_dtype=jnp.bfloat16, tm=None, tn=None, tk=None):
    """out[i] = x[i] @ w[inds[i]] + b[inds[i], 0]  (forward of CondMul)."""
    n, in_f = x.shape
    classes, in_f_w, out_f = w.shape
    assert in_f_w == in_f
    assert b.shape == (classes, 1, out_f)
    assert inds.shape == (n,)

    out_dtype = x.dtype
    itemsize = jnp.dtype(compute_dtype).itemsize
    sub_min = 16 if itemsize < 4 else 8  # bf16 needs 16-row sublane tiles

    # Guard against out-of-range class indices (no runtime bounds check on TPU).
    inds = jnp.clip(inds.astype(jnp.int32), 0, classes - 1)

    of_pad = _round_up(out_f, 128)  # lane-dense output / weight N

    # ---- per-generation VMEM budget -----------------------------------------
    try:
        phys_vmem = int(pltpu.get_tpu_info().vmem_capacity_bytes)
    except Exception:
        phys_vmem = 64 * 1024 * 1024  # conservative fallback (v7x per-TC VMEM)
    target = int(phys_vmem * 0.60)    # tile-selection target (headroom for internals)
    vmem_cap = int(phys_vmem * 0.80)  # hard cap handed to the compiler

    # ---- TM: rows per grid step ----------------------------------------------
    if tm is None:
        tm = min(256, max(sub_min, _round_up(pl.cdiv(n, classes), sub_min)))
    else:
        tm = _round_up(tm, sub_min)

    # ---- TN: output-feature lanes per grid step -------------------------------
    if tn is None:
        if of_pad <= 512:
            tn = of_pad
        else:
            m128 = of_pad // 128
            tn = 128
            for d in (4, 3, 2):
                if m128 % d == 0:
                    tn = 128 * d
                    break
    assert of_pad % tn == 0 and tn % 128 == 0
    n_n = of_pad // tn

    def _working_set(tk_, n_k_):
        # double-buffered x/w/b/out blocks + (optional) f32 accumulator scratch
        return (2 * tm * tk_ * itemsize + 2 * tk_ * tn * itemsize
                + 2 * tn * 4 + 2 * tm * tn * 4
                + (tm * tn * 4 if n_k_ > 1 else 0))

    # ---- TK: reduction split only when the full-IF block would blow VMEM ------
    if tk is None:
        if _working_set(in_f, 1) <= target:
            tk = in_f
        else:
            tk = 512
            while tk > 128 and _working_set(tk, 2) > target:
                tk //= 2
    if tk == in_f:
        in_f_pad, n_k = in_f, 1
    else:
        assert tk % 128 == 0
        in_f_pad = _round_up(in_f, tk)
        n_k = in_f_pad // tk

    # ---- group rows by class (static-shape JAX ops outside the kernel) --------
    p_rows = _round_up(n + classes * (tm - 1), tm)  # static bound on grouped rows
    num_tiles = p_rows // tm

    order = jnp.argsort(inds).astype(jnp.int32)                     # (n,)
    inds_sorted = inds[order]                                       # (n,)
    counts = jnp.bincount(inds, length=classes).astype(jnp.int32)   # (classes,)
    class_start = jnp.concatenate(
        [jnp.zeros((1,), jnp.int32), jnp.cumsum(counts)[:-1].astype(jnp.int32)])
    tiles_per_class = (counts + tm - 1) // tm
    pad_offset = tm * jnp.concatenate(
        [jnp.zeros((1,), jnp.int32),
         jnp.cumsum(tiles_per_class)[:-1].astype(jnp.int32)])

    s = jnp.arange(n, dtype=jnp.int32)
    rank_in_class = s - class_start[inds_sorted]
    pad_pos = pad_offset[inds_sorted] + rank_in_class  # padded slot per sorted row

    # padded-slot -> original-row map (padding slots read row 0; output discarded)
    row_map = jnp.zeros((p_rows,), jnp.int32).at[pad_pos].set(order)
    # class of each TM-row tile (unused trailing tiles -> class 0; output discarded)
    tile_class = jnp.zeros((num_tiles,), jnp.int32).at[pad_pos // tm].set(inds_sorted)
    # original-row -> padded-slot map (to unsort the output)
    inv_pos = jnp.zeros((n,), jnp.int32).at[order].set(pad_pos)

    # TODO(synk): the row gather / unsort below are extra HBM passes; in the
    # memory-bound regime fuse them into the caller (return permuted output +
    # inv_pos) or gather rows in-kernel via a scalar-prefetched row_map + DMA.
    x_c = x.astype(compute_dtype)
    x_grp = x_c[row_map]                                 # (p_rows, in_f)
    w_c = w.astype(compute_dtype)
    b_c = b.astype(jnp.float32)                          # bias added in f32
    if of_pad != out_f:
        w_c = jnp.pad(w_c, ((0, 0), (0, 0), (0, of_pad - out_f)))
        b_c = jnp.pad(b_c, ((0, 0), (0, 0), (0, of_pad - out_f)))
    if in_f_pad != in_f:
        x_grp = jnp.pad(x_grp, ((0, 0), (0, in_f_pad - in_f)))
        w_c = jnp.pad(w_c, ((0, 0), (0, in_f_pad - in_f), (0, 0)))

    use_acc = n_k > 1
    kernel = _cond_mul_kernel_acc if use_acc else _cond_mul_kernel_fused
    scratch = [pltpu.VMEM((tm, tn), jnp.float32)] if use_acc else []

    grid_spec = pltpu.PrefetchScalarGridSpec(
        num_scalar_prefetch=1,
        grid=(num_tiles, n_n, n_k),
        in_specs=[
            pl.BlockSpec((tm, tk), lambda ti, ni, ki, tc: (ti, ki)),
            pl.BlockSpec((1, tk, tn), lambda ti, ni, ki, tc: (tc[ti], ki, ni)),
            pl.BlockSpec((1, 1, tn), lambda ti, ni, ki, tc: (tc[ti], 0, ni)),
        ],
        out_specs=pl.BlockSpec((tm, tn), lambda ti, ni, ki, tc: (ti, ni)),
        scratch_shapes=scratch,
    )

    working_set = _working_set(tk, n_k)
    vmem_limit = int(min(max(int(working_set * 1.25), 32 * 1024 * 1024), vmem_cap))

    out_grp = pl.pallas_call(
        kernel,
        out_shape=jax.ShapeDtypeStruct((p_rows, of_pad), out_dtype),
        grid_spec=grid_spec,
        compiler_params=pltpu.CompilerParams(
            # Row-tile / N axes are independent -> "parallel" (megacore / dual-TC).
            # NOTE: if per-core sharding interleaves tile indices instead of
            # splitting them contiguously, same-class weight-DMA reuse drops;
            # revisit with an explicit leading core axis if weight re-DMA shows
            # up per step in profiles.
            dimension_semantics=("parallel", "parallel", "arbitrary"),
            vmem_limit_bytes=vmem_limit,
        ),
        cost_estimate=pl.CostEstimate(
            flops=2 * p_rows * in_f_pad * of_pad,
            transcendentals=0,
            bytes_accessed=int(
                n_n * p_rows * in_f_pad * itemsize        # x (re-read per N tile)
                + classes * in_f_pad * of_pad * itemsize  # weights (>= once each)
                + classes * of_pad * 4                    # bias
                + p_rows * of_pad * 4),                   # out
        ),
    )(tile_class, x_grp, w_c, b_c)

    # unsort rows + drop lane padding
    return out_grp[inv_pos, :out_f]


def cond_mul_ref(x, inds, w, b):
    # pure-JAX reference (forward semantics of the PyTorch module)
    wg = w[inds]          # (n, IF, OF)
    bg = b[inds, 0]       # (n, OF)
    return jnp.einsum("ni,nio->no", x, wg) + bg


if __name__ == "__main__":
    key = jax.random.PRNGKey(0)

    def make_case(case_key, classes, in_f, out_f, n):
        kx, ki, kw, kb = jax.random.split(case_key, 4)
        k = math.sqrt(1.0 / float(in_f))
        # deterministic parameter init, matching nn.Parameter(rand*2k - k)
        w = jax.random.uniform(kw, (classes, in_f, out_f), jnp.float32, -k, k)
        b = jax.random.uniform(kb, (classes, 1, out_f), jnp.float32, -k, k)
        x = jax.random.normal(kx, (n, in_f), jnp.float32)
        inds = jax.random.randint(ki, (n,), 0, classes, jnp.int32)
        return x, inds, w, b

    k1, k2, k3 = jax.random.split(key, 3)

    # Case 1: module-sized shapes, default bf16 MXU path.
    x, inds, w, b = make_case(k1, classes=4, in_f=32, out_f=32, n=16)
    out = jax.block_until_ready(cond_mul(x, inds, w, b))
    ref = cond_mul_ref(x, inds, w, b)
    assert out.shape == ref.shape and out.dtype == ref.dtype
    assert jnp.allclose(out, ref, atol=5e-2, rtol=5e-2), "bf16 path mismatch"

    # Case 2: strict-f32 fallback path, tight tolerance.
    out32 = jax.block_until_ready(cond_mul(x, inds, w, b, compute_dtype=jnp.float32))
    assert jnp.allclose(out32, ref, atol=1e-5, rtol=1e-5), "f32 path mismatch"

    # Case 3: exercise the N/K-split accumulator path with forced small tiles.
    x3, inds3, w3, b3 = make_case(k3, classes=2, in_f=256, out_f=256, n=64)
    out3 = jax.block_until_ready(cond_mul(x3, inds3, w3, b3, tn=128, tk=128))
    ref3 = cond_mul_ref(x3, inds3, w3, b3)
    assert jnp.allclose(out3, ref3, atol=5e-2, rtol=5e-2), "N/K-split path mismatch"

    print("KERNEL_OK")
</pallas_src>

<mosaic_0001>
module attributes {stable_mosaic.version = 11 : i64} {
  func.func @_cond_mul_kernel_fused(%arg0: i32, %arg1: i32, %arg2: i32, %arg3: memref<5xi32, #tpu.memory_space<smem>>, %arg4: memref<16x32xbf16, #tpu.memory_space<vmem>>, %arg5: memref<1x32x128xbf16, #tpu.memory_space<vmem>>, %arg6: memref<1x1x128xf32, #tpu.memory_space<vmem>>, %arg7: memref<16x128xf32, #tpu.memory_space<vmem>>) attributes {dimension_semantics = [#tpu.dimension_semantics<parallel>, #tpu.dimension_semantics<parallel>, #tpu.dimension_semantics<arbitrary>], iteration_bounds = array<i64: 5, 1, 1>, scalar_prefetch = 1 : i64, scratch_operands = 0 : i64, tpu.core_type = #tpu.core_type<tc>, window_params = [{transform_indices = @transform_0, window_bounds = array<i64: 16, 32>}, {transform_indices = @transform_1, window_bounds = array<i64: 1, 32, 128>}, {transform_indices = @transform_2, window_bounds = array<i64: 1, 1, 128>}, {transform_indices = @transform_3, window_bounds = array<i64: 16, 128>}]} {
    %c0 = arith.constant 0 : index
    %c0_0 = arith.constant 0 : index
    %0 = vector.load %arg4[%c0, %c0_0] : memref<16x32xbf16, #tpu.memory_space<vmem>>, vector<16x32xbf16>
    %c0_1 = arith.constant 0 : index
    %c0_2 = arith.constant 0 : index
    %c0_3 = arith.constant 0 : index
    %1 = vector.load %arg5[%c0_1, %c0_2, %c0_3] : memref<1x32x128xbf16, #tpu.memory_space<vmem>>, vector<1x32x128xbf16>
    %2 = vector.shape_cast %1 : vector<1x32x128xbf16> to vector<32x128xbf16>
    %cst = arith.constant dense<0.000000e+00> : vector<16x128xf32>
    %3 = tpu.matmul %0, %2, %cst {dimension_numbers = #tpu.dot_dimension_numbers<[1], [0], [0], [1], [0, 0, 1, 1], [], []>} : vector<16x32xbf16>, vector<32x128xbf16>, vector<16x128xf32> -> vector<16x128xf32>
    %c0_4 = arith.constant 0 : index
    %c0_5 = arith.constant 0 : index
    %c0_6 = arith.constant 0 : index
    %4 = vector.load %arg6[%c0_4, %c0_5, %c0_6] : memref<1x1x128xf32, #tpu.memory_space<vmem>>, vector<1x1x128xf32>
    %5 = vector.shape_cast %4 : vector<1x1x128xf32> to vector<1x128xf32>
    %6 = vector.broadcast %5 : vector<1x128xf32> to vector<16x128xf32>
    %7 = arith.addf %3, %6 : vector<16x128xf32>
    %c0_7 = arith.constant 0 : index
    %c0_8 = arith.constant 0 : index
    %8 = vector.load %arg7[%c0_7, %c0_8] : memref<16x128xf32, #tpu.memory_space<vmem>>, vector<16x128xf32>
    tpu.vector_store %arg7[%c0_7, %c0_8], %7 {strides = array<i32>} : memref<16x128xf32, #tpu.memory_space<vmem>>, vector<16x128xf32>,
    return
  }
  func.func @transform_0(%arg0: i32, %arg1: i32, %arg2: i32, %arg3: memref<5xi32, #tpu.memory_space<smem>>) -> (i32, i32) {
    %c0_i32 = arith.constant 0 : i32
    return %arg0, %arg2 : i32, i32
  }
  func.func @transform_1(%arg0: i32, %arg1: i32, %arg2: i32, %arg3: memref<5xi32, #tpu.memory_space<smem>>) -> (i32, i32, i32) {
    %0 = arith.index_cast %arg0 : i32 to index
    %1 = memref.load %arg3[%0] : memref<5xi32, #tpu.memory_space<smem>>
    %c0_i32 = arith.constant 0 : i32
    return %1, %arg2, %arg1 : i32, i32, i32
  }
  func.func @transform_2(%arg0: i32, %arg1: i32, %arg2: i32, %arg3: memref<5xi32, #tpu.memory_space<smem>>) -> (i32, i32, i32) {
    %0 = arith.index_cast %arg0 : i32 to index
    %1 = memref.load %arg3[%0] : memref<5xi32, #tpu.memory_space<smem>>
    %c0_i32 = arith.constant 0 : i32
    %c0_i32_0 = arith.constant 0 : i32
    return %1, %c0_i32, %arg1 : i32, i32, i32
  }
  func.func @transform_3(%arg0: i32, %arg1: i32, %arg2: i32, %arg3: memref<5xi32, #tpu.memory_space<smem>>) -> (i32, i32) {
    %c0_i32 = arith.constant 0 : i32
    return %arg0, %arg1 : i32, i32
  }
}

</mosaic_0001>

<bundles_post_ra>
// kernel: tpu_custom_call.1
= control target key start
LH: loop header
LB: loop body
LE: loop exit
PB: predicated region body
PF: predicated region fallthrough
CT: control target
= control target key end

     0   :  { %s764_s18 = smov [#allocation3]   ;;  %s974_s0 = inlined_call_operand.vmem [shape: s32[5], index: 0, kind: input, shape index: {}]   ;;  %s975_s1 = inlined_call_operand.vmem [shape: bf16[80,32], index: 1, kind: input, shape index: {}]   ;;  %s976_s2 = inlined_call_operand.hbm [shape: bf16[4,32,128], index: 2, kind: input, shape index: {}]   ;;  %s977_s3 = inlined_call_operand.vmem [shape: f32[4,1,128], index: 3, kind: input, shape index: {}]   ;;  %s978_s4 = inlined_call_operand.hbm [shape: f32[80,128], index: 4, kind: output, shape index: {}]  }
   0x1   :  { %s10_s17 = sshll.u32 %s974_s0, 4  ;;  %s11_s17 = int_to_ptr.vmem [resolvable:$true] %s10_s17 }
   0x2   :  { %13 = dma.vmem_to_smem %s11_s17, 16, %s764_s18, [#allocation2] }
   0x3   :  { %718 = dma.done.wait [#allocation2], 16 }
   0x4   :  { %719 = vsyncadd [#allocation2], 4294967280 }
   0x5   :  { %16 = sfence }
   0x6   :  { %17 = vsyncpa [#allocation5], 0 }
   0x7   :  { %19 = vsyncpa [#allocation5 + $0x1], 0 }
   0x8   :  { %20 = vsyncpa [#allocation6], 0 }
   0x9   :  { %22 = vsyncpa [#allocation6 + $0x1], 0  ;;  %s797_s19 = smov 0   ;;  %s799_s20 = smov 0  }
   0xa   :  { %s801_s21 = smov 0   ;;  %s803_s22 = smov 0  }
   0xb   :  { %s805_s23 = smov 0   ;;  %s807_s0 = smov 0  }
   0xc   :  { %s809_s24 = smov 0   ;;  %s811_s25 = smov 0  }
   0xd   :  { %s813_s26 = smov 0  }
   0xe LB: > { %982 = sst [smem:[#allocation13_spill]] %s750_s0  ;;  %s481_s27 = sadd.s32 4294967295, %s762_s26   ;;  %s762_s26 = sphi %s813_s26, %s28_s26   ;;  %s758_s25 = sphi %s811_s25, %s995_s25   ;;  %s754_s24 = sphi %s809_s24, %s994_s24   ;;  %s750_s0 = sphi %s807_s0, %s993_s0   ;;  %s746_s23 = sphi %s805_s23, %s1000_s23   ;;  %s742_s22 = sphi %s803_s22, %s999_s22   ;;  %s738_s21 = sphi %s801_s21, %s998_s21   ;;  %s734_s20 = sphi %s799_s20, %s997_s20   ;;  %s730_s19 = sphi %s797_s19, %s996_s19  }
   0xf   : > { %983 = sst [smem:[#allocation14_spill]] %s758_s25  ;;  %s482_s28 = sadd.s32 4294967294, %s762_s26  }
  0x10   : > { %s47_s29 = sadd.s32 1, %s758_s25  ;;  %s79_s30 = sld [smem:[#allocation3 + %s758_s25]] }
  0x11   : > { %p49_p0 = scmp.ge.s32.totalorder %s47_s29, 5  ;;  %s88_s5 = sadd.s32 1, %s750_s0 }
  0x12   : > { %p95_p1 = scmp.ne.s32.totalorder %s750_s0, %s746_s23  ;;  %p96_p2 = scmp.eq.s32.totalorder %s762_s26, 0 }
  0x13   : > { %s1002_s29 = smov (%p49_p0, %s47_s29), 0  ;;  %p101_p4 = scmp.ne.s32.totalorder %s746_s23, %s742_s22 }
  0x14   : > { %984 = sst [smem:[#allocation15_spill]] %s1002_s29  ;;  %p850_p3 = por %p96_p2, %p95_p1 }
  0x15   : > { %s80_s7 = sld [smem:[#allocation3 + %s1002_s29]]  ;;  %p102_p5 = scmp.eq.s32.totalorder %s481_s27, 0 }
  0x16   : > { %s141_s8 = ssub.s32 %s758_s25, %s1002_s29  ;;  %s146_s9 = sadd.s32 1, %s738_s21 }
  0x17   : > { %p859_p6 = por %p102_p5, %p101_p4  ;;  %p144_p7 = scmp.eq.s32.totalorder %s141_s8, 0 }
  0x18   : > { %p156_p8 = scmp.ne.s32.totalorder %s738_s21, %s734_s20  ;;  %p157_p9 = scmp.eq.s32.totalorder %s481_s27, 4 }
  0x19   : > { %s866_s11 = scalar_select %p144_p7, %s738_s21, %s146_s9  }
  0x1a   : > { %p868_p10 = por %p157_p9, %p156_p8  ;;  %p162_p11 = scmp.ne.s32.totalorder %s734_s20, %s730_s19 }
  0x1b   : > { %s81_s13 = ssub.s32 %s79_s30, %s80_s7  ;;  %p163_p12 = scmp.eq.s32.totalorder %s482_s28, 4 }
  0x1c   : > { %p86_p13 = scmp.eq.s32.totalorder %s81_s13, 0  ;;  %p532_p1 = scmp.lt.s32.totalorder %s762_s26, 5 }
  0x1d   : > { %p874_p0 = por %p163_p12, %p162_p11  ;;  %s195_s16 = sand.u32 1, %s750_s0  }
  0x1e   : > { %s880_s15 = scalar_select %p86_p13, %s750_s0, %s88_s5  }
  0x1f   : > { %p885_p2 = pnand %p532_p1, %p850_p3  ;;  %s485_s18 = sshll.u32 %s195_s16, 4 }
  0x20   : > { %989 = sst [smem:[#allocation16_spill]] %s880_s15  ;;  %p488_p4 = scmp.ge.s32.totalorder %s762_s26, 1 }
  0x21   : > { %s516_s22 = scalar_select %p850_p3, [#allocation3], [#allocation8] }
  0x22   : > { %s517_s27 = scalar_select %p850_p3, %s758_s25, 0 }
  0x23   : > { %s1004_s22 = smov (!%p532_p1, %s516_s22), [#allocation9]  ;;  %p230_p5 = scmp.lt.s32.totalorder %s762_s26, 6 }
  0x24   : > { %s1006_s27 = smov (!%p532_p1, %s517_s27), 0  ;;  %s199_s30 = scalar_lea.vmem [#allocation4], %s485_s18 }
  0x25   : > { %s200_s28 = sld [smem:[%s1004_s22 + %s1006_s27]]  ;;  %s211_s5 = sshll.u32 %s199_s30, 4  ;;  %s212_s5 = int_to_ptr.vmem [resolvable:$true] %s211_s5 }
  0x26   : > { %p896_p7 = pnand %p488_p4, %p230_p5  ;;  %s196_s25 = scalar_lea.sflag [#allocation5], %s195_s16 }
  0x27   : > { %p628_p8 = pneg %p885_p2 }
  0x2b   : > { %s511_s8 = sshll.u32 %s200_s28, 4  ;;  %s631_s28 = scalar_lea.hbm %s976_s2, 64 }
  0x2c   : > { %s208_s29 = scalar_lea.hbm %s976_s2, %s511_s8 }
  0x2d   : > { %s209_s6 = sshll.u32 %s208_s29, 4  ;;  %s210_s6 = int_to_ptr.hbm [resolvable:$true] %s209_s6 }
  0x2e   : > { %s624_s15 = sshra.s32 %s210_s6, 4  ;;  %s625_s15 = int_to_ptr.hbm [resolvable:$true] %s624_s15 }
  0x2f   : > { %s626_s22 = scalar_lea.hbm %s625_s15, 16  ;;  %p632_p12 = scmp.lt.s32.totalorder %s625_s15, %s976_s2 }
  0x30   : > { %p627_p3 = scmp.ne.s32.totalorder %s625_s15, %s626_s22  ;;  %p633_p13 = scmp.lt.s32.totalorder %s631_s28, %s626_s22 }
  0x32   : > { %p629_p9 = pnand %p628_p8, %p627_p3  ;;  %p634_p1 = por %p633_p13, %p632_p12 }
  0x34   : > { %p630_p11 = pneg %p629_p9 }
  0x36   : > { %p635_p4 = pnand %p634_p1, %p630_p11 }
  0x38   : > { %638 = shalt.err (!%p635_p4)
}
  0x39   : > { %s765_s29 = smov 64   ;;  %s766_s16 = smov 4  }
  0x3a   : > { %527 = dma.hbm_to_vmem [thread:$0]  (!%p885_p2), %s210_s6, 256, %s212_s5, %s196_s25, %s765_s29, %s765_s29, %s766_s16  }
  0x3b   : > { %234 = sbr.rel (%p896_p7) target bundleno = 213 (0xd5), region = 32  ;;  %s236_s8 = sand.u32 (!%p896_p7), 1, %s746_s23  }
  0x3c   : > { %s489_s9 = sshll.u32 (!%p896_p7), %s236_s8, 4  ;;  %s237_s13 = scalar_lea.sflag (!%p896_p7), [#allocation5], %s236_s8 }
  0x3d   : > { %s240_s18 = scalar_lea.vmem (!%p896_p7), [#allocation4], %s489_s9 }
  0x40   : > { %721 = dma.done.wait (%p859_p6), %s237_s13, 256  }
  0x41   : > { %723 = vsyncadd (%p859_p6), %s237_s13, 4294967040  ;;  %s491_s0 = sshll.u32 %s754_s24, 1  ;;  %s290_s25 = sld [smem:[#allocation3 + %s754_s24]]  ;;  %v514_v0 = vld [vmem:[%s240_s18 + $0x8] sm:$0xff]  ;;  %v513_v1 = vld [vmem:[%s240_s18] sm:$0xff]  ;;  %vm327_vm0 = vcmask 261120  }
  0x42   : > { %p280_p5 = scmp.lt.s32.totalorder %s491_s0, 9  ;;  %337 = vmatpush.bf16.msra.mxu0 %v514_v0  ;;  %s276_s27 = sand.u32 1, %s734_s20  }
  0x43   : > { %s490_s28 = sshll.u32 %s276_s27, 4  ;;  %s515_s30 = sshll.u32 %s754_s24, 4 }
  0x44   : > { %s1008_s0 = smov (!%p280_p5, %s491_s0), 9  ;;  %s360_s8 = scalar_lea.hbm %s978_s4, %s515_s30 }
  0x45   : > { %s492_s15 = sshll.u32 %s1008_s0, 2  ;;  %s278_s9 = scalar_lea.vmem [#allocation7], %s490_s28 }
  0x46   : > { %s286_s7 = scalar_lea.vmem %s975_s1, %s492_s15  ;;  %338 = vmatpush.bf16.msra.mxu0 %v513_v1  ;;  %s361_s13 = sshll.u32 %s278_s9, 4  ;;  %s362_s13 = int_to_ptr.vmem [resolvable:$true] %s361_s13 }
  0x47   : > { %p291_p2 = scmp.lt.s32.totalorder %s290_s25, 3  ;;  %v512_v2 = vld [vmem:[%s286_s7] sm:$0xff]  ;;  %s363_s18 = sshll.u32 %s360_s8, 4  ;;  %s364_s18 = int_to_ptr.hbm [resolvable:$true] %s363_s18 }
  0x48   : > { %s348_s0 = scalar_lea.sflag [#allocation6], %s276_s27  ;;  %s674_s5 = scalar_lea.hbm %s978_s4, 80 }
  0x49   : > { %s1010_s25 = smov (!%p291_p2, %s290_s25), 3  ;;  %505 = vmatmul.msk.bf16.vlgmr.msra.gmra.mxu0 %vm327_vm0, %v512_v2 }
  0x4a   : > { %s296_s22 = scalar_lea.vmem %s977_s3, %s1010_s25  ;;  %s668_s25 = sshra.s32 %s364_s18, 4  ;;  %s669_s25 = int_to_ptr.hbm [resolvable:$true] %s668_s25 }
  0x4b   : > { %v611_v3 = vld [vmem:[%s296_s22] ss:$0 sm:$0xff]  ;;  %s670_s24 = scalar_lea.hbm %s669_s25, 16  ;;  %p675_p8 = scmp.lt.s32.totalorder %s669_s25, %s978_s4 }
  0x4c   : > { %p671_p6 = scmp.ne.s32.totalorder %s669_s25, %s670_s24  ;;  %p676_p9 = scmp.lt.s32.totalorder %s674_s5, %s670_s24 }
  0x4e   : > { %p672_p7 = pnand %p671_p6, %p868_p10  ;;  %p677_p11 = por %p676_p9, %p675_p8 }
  0x50   : > { %p673_p3 = pneg %p672_p7 }
  0x52   : > { %p678_p12 = pnand %p677_p11, %p673_p3 }
  0xc6   : > { %v340_v4 = vpop.f32.mrf.mxu0 }
  0xc7   : > { %v341_v5 = vadd.f32 %v611_v3, %v340_v4 }
  0xc9   : > { %345 = vst [vmem:[%s278_s9] sm:$0xff] %v341_v5 }
  0xce   : > { %v342_v6 = vpop.f32.mrf.mxu0 }
  0xcf   : > { %v343_v7 = vadd.f32 %v611_v3, %v342_v6 }
  0xd1   : > { %346 = vst [vmem:[%s278_s9 + $0x8] sm:$0xff] %v343_v7 }
  0xd2   : > { %681 = shalt.err (!%p678_p12)
}
  0xd3   : > { %s767_s6 = smov 128   ;;  %s768_s22 = smov 8  }
  0xd4   : > { %520 = dma.vmem_to_hbm [thread:$0]  (%p868_p10), %s362_s13, 256, %s364_s18, %s348_s0, %s767_s6, %s767_s6, %s768_s22  }
  0xd5 PF: > { %p533_p13 = scmp.ge.s32.totalorder %s762_s26, 2  ;;  %s378_s27 = sand.u32 1, %s730_s19  }
  0xd6   : > { %s379_s28 = scalar_lea.sflag [#allocation6], %s378_s27 }
  0xd7   : > { %p529_p1 = pnand %p533_p13, %p874_p0 }
  0xd9   : > { %p530_p4 = pneg %p529_p1 }
  0xdb   : > { %725 = dma.done.wait (%p530_p4), %s379_s28, 256  }
  0xdc   : > { %727 = vsyncadd (%p530_p4), %s379_s28, 4294967040  ;;  %s28_s26 = sadd.s32 1, %s762_s26   ;;  %s992_s12 = sld [smem:[#allocation13_spill]] }
  0xdd   : > { %p25_p5 = scmp.ge.s32.totalorder %s28_s26, 7   ;;  %s993_s0 = sld [smem:[#allocation16_spill]] }
  0xde   : > { %s994_s24 = sld [smem:[#allocation14_spill]]  ;;  %s996_s19 = smov %s734_s20 }
  0xdf   : > { %s995_s25 = sld [smem:[#allocation15_spill]]  ;;  %s997_s20 = smov %s738_s21 }
  0xe0   : > { %s998_s21 = smov %s866_s11  ;;  %s999_s22 = smov %s746_s23 }
  0xe1   :  { %27 = sbr.rel (!%p25_p5) target bundleno = 14 (0xe), region = 83 }
  0xe2   : > { %s1000_s23 = smov %s992_s12 }
  0xe6   :  { %385 = vsyncpa [#allocation5], 1 }
  0xe7   :  { %387 = vsyncpa [#allocation5 + $0x1], 1 }
  0xe8   :  { %388 = vsyncpa [#allocation6], 1 }
  0xe9   :  { %390 = vsyncpa [#allocation6 + $0x1], 1 }

</bundles_post_ra>
